<compile_context>
chip_gen: v5e
topology: v5e:2x2
jax: 0.10.0
libtpu: 0.0.40
codegen_flags: <defaults>
</compile_context>

<pallas_src>
import functools

import jax
import jax.numpy as jnp
from jax.experimental import pallas as pl
from jax.experimental.pallas import tpu as pltpu

LANE = 128
SUBLANE = 8
MAX_BATCH_TILE = 256  # rows per grid step once batches get large


def _round_up(x, m):
    return ((x + m - 1) // m) * m


def _pad_to(a, shape):
    """Zero-pad array `a` up to `shape` (no-op if already that shape)."""
    pads = [(0, s - d) for d, s in zip(a.shape, shape)]
    if all(p == (0, 0) for p in pads):
        return a
    return jnp.pad(a, pads)


def _autoencoder_kernel(*refs, n_layers):
    """Fused forward: encode (last pre-sigmoid activation) then decode.

    refs layout: x, (W_0, hb_0), ..., (W_{n-1}, hb_{n-1}),
                 (Wt_0, vb_0), ..., (Wt_{n-1}, vb_{n-1}), out
    Decoder weights are already transposed in the wrapper, so every layer is a
    plain x @ W matmul on the MXU.
    """
    x_ref = refs[0]
    enc = refs[1 : 1 + 2 * n_layers]
    dec = refs[1 + 2 * n_layers : 1 + 4 * n_layers]
    o_ref = refs[-1]

    # ---- encode ----
    p_v = x_ref[...]
    activation = p_v
    for i in range(n_layers):
        w = enc[2 * i][...]
        b = enc[2 * i + 1][...]
        activation = jnp.dot(p_v, w, preferred_element_type=jnp.float32) + b
        if i < n_layers - 1:  # last encoder sigmoid is never used -> skip it
            p_v = jax.nn.sigmoid(activation)

    # ---- decode ----
    p_h = activation
    for i in range(n_layers):
        wt = dec[2 * i][...]
        b = dec[2 * i + 1][...]
        p_h = jax.nn.sigmoid(
            jnp.dot(p_h, wt, preferred_element_type=jnp.float32) + b
        )

    o_ref[...] = p_h.astype(o_ref.dtype)


@jax.jit
def deep_autoencoder_forward(v, encoders, encoder_biases, decoders, decoder_biases):
    """Single fused Pallas kernel mirroring DeepAutoencoder.forward."""
    n = len(encoders)
    B, in_dim = v.shape

    # Batch tiling: pad to sublane multiple, tile in chunks of <= MAX_BATCH_TILE.
    b_aligned = _round_up(B, SUBLANE)
    tile_b = min(b_aligned, MAX_BATCH_TILE)
    b_pad = _round_up(b_aligned, tile_b)
    num_b_tiles = b_pad // tile_b

    in_pad = _round_up(in_dim, LANE)

    args = []
    # Input: lane + sublane padded.
    args.append(_pad_to(v, (b_pad, in_pad)))

    # Encoder params: W (vdim, hdim), h_bias (hdim,) -> padded, bias as (1, hp).
    for W, hb in zip(encoders, encoder_biases):
        vd, hd = W.shape
        vp, hp = _round_up(vd, LANE), _round_up(hd, LANE)
        args.append(_pad_to(W, (vp, hp)))
        args.append(_pad_to(hb.reshape(1, hd), (1, hp)))

    # Decoder params: pre-transpose W once so the kernel does p_h @ Wt directly.
    for W, vb in zip(decoders, decoder_biases):
        vd, hd = W.shape  # decode computes p_h @ W.T : (B, hd) @ (hd, vd)
        vp, hp = _round_up(vd, LANE), _round_up(hd, LANE)
        args.append(_pad_to(W.T, (hp, vp)))           # (hp, vp)
        args.append(_pad_to(vb.reshape(1, vd), (1, vp)))

    out_dim = decoders[-1].shape[0]
    out_pad = _round_up(out_dim, LANE)

    # BlockSpecs: x / out tile over the batch grid axis; params return block
    # index (0, 0) for every grid step so they stay resident in VMEM.
    in_specs = [pl.BlockSpec((tile_b, in_pad), lambda i: (i, 0))]
    for a in args[1:]:
        in_specs.append(pl.BlockSpec(a.shape, lambda i: (0, 0)))
    out_spec = pl.BlockSpec((tile_b, out_pad), lambda i: (i, 0))

    kernel = functools.partial(_autoencoder_kernel, n_layers=n)
    out = pl.pallas_call(
        kernel,
        out_shape=jax.ShapeDtypeStruct((b_pad, out_pad), v.dtype),
        grid=(num_b_tiles,),
        in_specs=in_specs,
        out_specs=out_spec,
        compiler_params=pltpu.CompilerParams(
            dimension_semantics=("parallel",),
        ),
    )(*args)
    return out[:B, :out_dim]


def _reference_forward(v, encoders, encoder_biases, decoders, decoder_biases):
    """Plain-JAX reference, identical semantics to the PyTorch module."""
    p_v = v
    activation = v
    for W, hb in zip(encoders, encoder_biases):
        activation = p_v @ W + hb
        p_v = jax.nn.sigmoid(activation)
    p_h = activation
    for W, vb in zip(decoders, decoder_biases):
        p_h = jax.nn.sigmoid(p_h @ W.T + vb)
    return p_h


if __name__ == "__main__":
    # Small, deterministic synthetic RBM stack with non-aligned dims to
    # exercise the padding path: dims 100 -> 48 -> 20, batch 6.
    key = jax.random.PRNGKey(0)
    dims = [100, 48, 20]
    batch = 6

    encoders, encoder_biases, decoders, decoder_biases = [], [], [], []
    for li in range(len(dims) - 1):
        vdim, hdim = dims[li], dims[li + 1]
        key, kw, kh, kv = jax.random.split(key, 4)
        W = 0.1 * jax.random.normal(kw, (vdim, hdim), dtype=jnp.float32)
        h_bias = 0.1 * jax.random.normal(kh, (hdim,), dtype=jnp.float32)
        v_bias = 0.1 * jax.random.normal(kv, (vdim,), dtype=jnp.float32)
        encoders.append(W)
        encoder_biases.append(h_bias)
        decoders.append(W)
        decoder_biases.append(v_bias)

    # Match nn.ParameterList(reversed(...)) in the PyTorch __init__.
    decoders = list(reversed(decoders))
    decoder_biases = list(reversed(decoder_biases))

    key, kx = jax.random.split(key)
    x = jax.random.uniform(kx, (batch, dims[0]), dtype=jnp.float32)

    out = deep_autoencoder_forward(x, encoders, encoder_biases, decoders, decoder_biases)
    out = jax.block_until_ready(out)

    ref = _reference_forward(x, encoders, encoder_biases, decoders, decoder_biases)
    assert out.shape == (batch, dims[0]), out.shape
    assert jnp.allclose(out, ref, atol=1e-5, rtol=1e-5)

    print("KERNEL_OK")
</pallas_src>

<mosaic_0001>
module attributes {stable_mosaic.version = 11 : i64} {
  func.func @_autoencoder_kernel(%arg0: i32, %arg1: memref<8x128xf32, #tpu.memory_space<vmem>>, %arg2: memref<128x128xf32, #tpu.memory_space<vmem>>, %arg3: memref<1x128xf32, #tpu.memory_space<vmem>>, %arg4: memref<128x128xf32, #tpu.memory_space<vmem>>, %arg5: memref<1x128xf32, #tpu.memory_space<vmem>>, %arg6: memref<128x128xf32, #tpu.memory_space<vmem>>, %arg7: memref<1x128xf32, #tpu.memory_space<vmem>>, %arg8: memref<128x128xf32, #tpu.memory_space<vmem>>, %arg9: memref<1x128xf32, #tpu.memory_space<vmem>>, %arg10: memref<8x128xf32, #tpu.memory_space<vmem>>) attributes {dimension_semantics = [#tpu.dimension_semantics<parallel>], iteration_bounds = array<i64: 1>, scalar_prefetch = 0 : i64, scratch_operands = 0 : i64, tpu.core_type = #tpu.core_type<tc>, window_params = [{transform_indices = @transform_0, window_bounds = array<i64: 8, 128>}, {pipeline_mode = #tpu.pipeline_mode<synchronous>, transform_indices = @transform_1, window_bounds = array<i64: 128, 128>}, {pipeline_mode = #tpu.pipeline_mode<synchronous>, transform_indices = @transform_2, window_bounds = array<i64: 1, 128>}, {pipeline_mode = #tpu.pipeline_mode<synchronous>, transform_indices = @transform_3, window_bounds = array<i64: 128, 128>}, {pipeline_mode = #tpu.pipeline_mode<synchronous>, transform_indices = @transform_4, window_bounds = array<i64: 1, 128>}, {pipeline_mode = #tpu.pipeline_mode<synchronous>, transform_indices = @transform_5, window_bounds = array<i64: 128, 128>}, {pipeline_mode = #tpu.pipeline_mode<synchronous>, transform_indices = @transform_6, window_bounds = array<i64: 1, 128>}, {pipeline_mode = #tpu.pipeline_mode<synchronous>, transform_indices = @transform_7, window_bounds = array<i64: 128, 128>}, {pipeline_mode = #tpu.pipeline_mode<synchronous>, transform_indices = @transform_8, window_bounds = array<i64: 1, 128>}, {transform_indices = @transform_9, window_bounds = array<i64: 8, 128>}]} {
    %c0 = arith.constant 0 : index
    %c0_0 = arith.constant 0 : index
    %0 = vector.load %arg1[%c0, %c0_0] : memref<8x128xf32, #tpu.memory_space<vmem>>, vector<8x128xf32>
    %c0_1 = arith.constant 0 : index
    %c0_2 = arith.constant 0 : index
    %1 = vector.load %arg2[%c0_1, %c0_2] : memref<128x128xf32, #tpu.memory_space<vmem>>, vector<128x128xf32>
    %c0_3 = arith.constant 0 : index
    %c0_4 = arith.constant 0 : index
    %2 = vector.load %arg3[%c0_3, %c0_4] : memref<1x128xf32, #tpu.memory_space<vmem>>, vector<1x128xf32>
    %cst = arith.constant dense<0.000000e+00> : vector<8x128xf32>
    %3 = tpu.matmul %0, %1, %cst {dimension_numbers = #tpu.dot_dimension_numbers<[1], [0], [0], [1], [0, 0, 1, 1], [], []>} : vector<8x128xf32>, vector<128x128xf32>, vector<8x128xf32> -> vector<8x128xf32>
    %4 = vector.broadcast %2 : vector<1x128xf32> to vector<8x128xf32>
    %5 = arith.addf %3, %4 : vector<8x128xf32>
    %6 = arith.negf %5 : vector<8x128xf32>
    %7 = math.exp %6 : vector<8x128xf32>
    %cst_5 = arith.constant 1.000000e+00 : f32
    %8 = vector.broadcast %cst_5 : f32 to vector<8x128xf32>
    %9 = arith.addf %8, %7 : vector<8x128xf32>
    %10 = arith.divf %8, %9 : vector<8x128xf32>
    %c0_6 = arith.constant 0 : index
    %c0_7 = arith.constant 0 : index
    %11 = vector.load %arg4[%c0_6, %c0_7] : memref<128x128xf32, #tpu.memory_space<vmem>>, vector<128x128xf32>
    %c0_8 = arith.constant 0 : index
    %c0_9 = arith.constant 0 : index
    %12 = vector.load %arg5[%c0_8, %c0_9] : memref<1x128xf32, #tpu.memory_space<vmem>>, vector<1x128xf32>
    %cst_10 = arith.constant dense<0.000000e+00> : vector<8x128xf32>
    %13 = tpu.matmul %10, %11, %cst_10 {dimension_numbers = #tpu.dot_dimension_numbers<[1], [0], [0], [1], [0, 0, 1, 1], [], []>} : vector<8x128xf32>, vector<128x128xf32>, vector<8x128xf32> -> vector<8x128xf32>
    %14 = vector.broadcast %12 : vector<1x128xf32> to vector<8x128xf32>
    %15 = arith.addf %13, %14 : vector<8x128xf32>
    %c0_11 = arith.constant 0 : index
    %c0_12 = arith.constant 0 : index
    %16 = vector.load %arg6[%c0_11, %c0_12] : memref<128x128xf32, #tpu.memory_space<vmem>>, vector<128x128xf32>
    %c0_13 = arith.constant 0 : index
    %c0_14 = arith.constant 0 : index
    %17 = vector.load %arg7[%c0_13, %c0_14] : memref<1x128xf32, #tpu.memory_space<vmem>>, vector<1x128xf32>
    %cst_15 = arith.constant dense<0.000000e+00> : vector<8x128xf32>
    %18 = tpu.matmul %15, %16, %cst_15 {dimension_numbers = #tpu.dot_dimension_numbers<[1], [0], [0], [1], [0, 0, 1, 1], [], []>} : vector<8x128xf32>, vector<128x128xf32>, vector<8x128xf32> -> vector<8x128xf32>
    %19 = vector.broadcast %17 : vector<1x128xf32> to vector<8x128xf32>
    %20 = arith.addf %18, %19 : vector<8x128xf32>
    %21 = arith.negf %20 : vector<8x128xf32>
    %22 = math.exp %21 : vector<8x128xf32>
    %cst_16 = arith.constant 1.000000e+00 : f32
    %23 = vector.broadcast %cst_16 : f32 to vector<8x128xf32>
    %24 = arith.addf %23, %22 : vector<8x128xf32>
    %25 = arith.divf %23, %24 : vector<8x128xf32>
    %c0_17 = arith.constant 0 : index
    %c0_18 = arith.constant 0 : index
    %26 = vector.load %arg8[%c0_17, %c0_18] : memref<128x128xf32, #tpu.memory_space<vmem>>, vector<128x128xf32>
    %c0_19 = arith.constant 0 : index
    %c0_20 = arith.constant 0 : index
    %27 = vector.load %arg9[%c0_19, %c0_20] : memref<1x128xf32, #tpu.memory_space<vmem>>, vector<1x128xf32>
    %cst_21 = arith.constant dense<0.000000e+00> : vector<8x128xf32>
    %28 = tpu.matmul %25, %26, %cst_21 {dimension_numbers = #tpu.dot_dimension_numbers<[1], [0], [0], [1], [0, 0, 1, 1], [], []>} : vector<8x128xf32>, vector<128x128xf32>, vector<8x128xf32> -> vector<8x128xf32>
    %29 = vector.broadcast %27 : vector<1x128xf32> to vector<8x128xf32>
    %30 = arith.addf %28, %29 : vector<8x128xf32>
    %31 = arith.negf %30 : vector<8x128xf32>
    %32 = math.exp %31 : vector<8x128xf32>
    %cst_22 = arith.constant 1.000000e+00 : f32
    %33 = vector.broadcast %cst_22 : f32 to vector<8x128xf32>
    %34 = arith.addf %33, %32 : vector<8x128xf32>
    %35 = arith.divf %33, %34 : vector<8x128xf32>
    %c0_23 = arith.constant 0 : index
    %c0_24 = arith.constant 0 : index
    %36 = vector.load %arg10[%c0_23, %c0_24] : memref<8x128xf32, #tpu.memory_space<vmem>>, vector<8x128xf32>
    tpu.vector_store %arg10[%c0_23, %c0_24], %35 {strides = array<i32>} : memref<8x128xf32, #tpu.memory_space<vmem>>, vector<8x128xf32>,
    return
  }
  func.func @transform_0(%arg0: i32) -> (i32, i32) {
    %c0_i32 = arith.constant 0 : i32
    %c0_i32_0 = arith.constant 0 : i32
    return %arg0, %c0_i32 : i32, i32
  }
  func.func @transform_1(%arg0: i32) -> (i32, i32) {
    %c0_i32 = arith.constant 0 : i32
    %c0_i32_0 = arith.constant 0 : i32
    %c0_i32_1 = arith.constant 0 : i32
    return %c0_i32, %c0_i32_0 : i32, i32
  }
  func.func @transform_2(%arg0: i32) -> (i32, i32) {
    %c0_i32 = arith.constant 0 : i32
    %c0_i32_0 = arith.constant 0 : i32
    %c0_i32_1 = arith.constant 0 : i32
    return %c0_i32, %c0_i32_0 : i32, i32
  }
  func.func @transform_3(%arg0: i32) -> (i32, i32) {
    %c0_i32 = arith.constant 0 : i32
    %c0_i32_0 = arith.constant 0 : i32
    %c0_i32_1 = arith.constant 0 : i32
    return %c0_i32, %c0_i32_0 : i32, i32
  }
  func.func @transform_4(%arg0: i32) -> (i32, i32) {
    %c0_i32 = arith.constant 0 : i32
    %c0_i32_0 = arith.constant 0 : i32
    %c0_i32_1 = arith.constant 0 : i32
    return %c0_i32, %c0_i32_0 : i32, i32
  }
  func.func @transform_5(%arg0: i32) -> (i32, i32) {
    %c0_i32 = arith.constant 0 : i32
    %c0_i32_0 = arith.constant 0 : i32
    %c0_i32_1 = arith.constant 0 : i32
    return %c0_i32, %c0_i32_0 : i32, i32
  }
  func.func @transform_6(%arg0: i32) -> (i32, i32) {
    %c0_i32 = arith.constant 0 : i32
    %c0_i32_0 = arith.constant 0 : i32
    %c0_i32_1 = arith.constant 0 : i32
    return %c0_i32, %c0_i32_0 : i32, i32
  }
  func.func @transform_7(%arg0: i32) -> (i32, i32) {
    %c0_i32 = arith.constant 0 : i32
    %c0_i32_0 = arith.constant 0 : i32
    %c0_i32_1 = arith.constant 0 : i32
    return %c0_i32, %c0_i32_0 : i32, i32
  }
  func.func @transform_8(%arg0: i32) -> (i32, i32) {
    %c0_i32 = arith.constant 0 : i32
    %c0_i32_0 = arith.constant 0 : i32
    %c0_i32_1 = arith.constant 0 : i32
    return %c0_i32, %c0_i32_0 : i32, i32
  }
  func.func @transform_9(%arg0: i32) -> (i32, i32) {
    %c0_i32 = arith.constant 0 : i32
    %c0_i32_0 = arith.constant 0 : i32
    return %arg0, %c0_i32 : i32, i32
  }
}

</mosaic_0001>

<bundles_post_ra>
// kernel: deep_autoencoder_forward.1
= control target key start
LH: loop header
LB: loop body
LE: loop exit
PB: predicated region body
PF: predicated region fallthrough
CT: control target
= control target key end

     0   :  { %s575_s0 = inlined_call_operand.vmem [shape: f32[8,128], index: 0, kind: input, shape index: {}]   ;;  %s576_s1 = inlined_call_operand.vmem [shape: f32[128,128], index: 1, kind: input, shape index: {}]   ;;  %s577_s2 = inlined_call_operand.vmem [shape: f32[1,128], index: 2, kind: input, shape index: {}]   ;;  %s578_s3 = inlined_call_operand.vmem [shape: f32[128,128], index: 3, kind: input, shape index: {}]   ;;  %s579_s4 = inlined_call_operand.vmem [shape: f32[1,128], index: 4, kind: input, shape index: {}]   ;;  %s580_s5 = inlined_call_operand.vmem [shape: f32[128,128], index: 5, kind: input, shape index: {}]   ;;  %s581_s6 = inlined_call_operand.vmem [shape: f32[1,128], index: 6, kind: input, shape index: {}]   ;;  %s582_s7 = inlined_call_operand.vmem [shape: f32[128,128], index: 7, kind: input, shape index: {}]   ;;  %s583_s8 = inlined_call_operand.vmem [shape: f32[1,128], index: 8, kind: input, shape index: {}]   ;;  %s584_s9 = inlined_call_operand.hbm [shape: f32[8,128], index: 9, kind: output, shape index: {}]  }
   0x1   :  { %v49_v0 = vld [vmem:[%s576_s1 + $0x78] sm:$0xff]  ;;  %v48_v1 = vld [vmem:[%s576_s1 + $0x70] sm:$0xff]  ;;  %v47_v2 = vld [vmem:[%s576_s1 + $0x68] sm:$0xff] }
   0x2   :  { %54 = vmatpush.msra.mxu0 %v49_v0  ;;  %v46_v3 = vld [vmem:[%s576_s1 + $0x60] sm:$0xff]  ;;  %v45_v4 = vld [vmem:[%s576_s1 + $0x58] sm:$0xff] }
   0x4   :  { %55 = vmatpush.msra.mxu0 %v48_v1 }
   0x6   :  { %56 = vmatpush.msra.mxu0 %v47_v2 }
   0x8   :  { %57 = vmatpush.msra.mxu0 %v46_v3 }
   0x9   :  { %14 = vsyncpa [#allocation3], 0  ;;  %v44_v5 = vld [vmem:[%s576_s1 + $0x50] sm:$0xff]  ;;  %v43_v6 = vld [vmem:[%s576_s1 + $0x48] sm:$0xff] }
   0xa   :  { %58 = vmatpush.msra.mxu0 %v45_v4  ;;  %v42_v7 = vld [vmem:[%s576_s1 + $0x40] sm:$0xff]  ;;  %v41_v8 = vld [vmem:[%s576_s1 + $0x38] sm:$0xff]  ;;  %v40_v9 = vld [vmem:[%s576_s1 + $0x30] sm:$0xff] }
   0xb   :  { %v39_v10 = vld [vmem:[%s576_s1 + $0x28] sm:$0xff]  ;;  %v38_v11 = vld [vmem:[%s576_s1 + $0x20] sm:$0xff]  ;;  %v37_v12 = vld [vmem:[%s576_s1 + $0x18] sm:$0xff] }
   0xc   :  { %59 = vmatpush.msra.mxu0 %v44_v5  ;;  %v36_v13 = vld [vmem:[%s576_s1 + $0x10] sm:$0xff]  ;;  %v35_v14 = vld [vmem:[%s576_s1 + $0x8] sm:$0xff]  ;;  %v34_v15 = vld [vmem:[%s576_s1] sm:$0xff] }
   0xd   :  { %v33_v16 = vld [vmem:[%s575_s0] sm:$0xff]  ;;  %v108_v17 = vld [vmem:[%s578_s3 + $0x78] sm:$0xff]  ;;  %v107_v18 = vld [vmem:[%s578_s3 + $0x70] sm:$0xff] }
   0xe   :  { %60 = vmatpush.msra.mxu0 %v43_v6  ;;  %113 = vmatpush.msra.mxu1 %v108_v17  ;;  %v106_v19 = vld [vmem:[%s578_s3 + $0x68] sm:$0xff]  ;;  %v105_v20 = vld [vmem:[%s578_s3 + $0x60] sm:$0xff]  ;;  %v104_v21 = vld [vmem:[%s578_s3 + $0x58] sm:$0xff] }
   0xf   :  { %v103_v22 = vld [vmem:[%s578_s3 + $0x50] sm:$0xff]  ;;  %v102_v23 = vld [vmem:[%s578_s3 + $0x48] sm:$0xff]  ;;  %v101_v24 = vld [vmem:[%s578_s3 + $0x40] sm:$0xff] }
  0x10   :  { %61 = vmatpush.msra.mxu0 %v42_v7  ;;  %114 = vmatpush.msra.mxu1 %v107_v18  ;;  %v100_v25 = vld [vmem:[%s578_s3 + $0x38] sm:$0xff]  ;;  %v99_v26 = vld [vmem:[%s578_s3 + $0x30] sm:$0xff]  ;;  %v98_v27 = vld [vmem:[%s578_s3 + $0x28] sm:$0xff] }
  0x11   :  { %v97_v28 = vld [vmem:[%s578_s3 + $0x20] sm:$0xff]  ;;  %v96_v29 = vld [vmem:[%s578_s3 + $0x18] sm:$0xff]  ;;  %v95_v30 = vld [vmem:[%s578_s3 + $0x10] sm:$0xff] }
  0x12   :  { %62 = vmatpush.msra.mxu0 %v41_v8  ;;  %115 = vmatpush.msra.mxu1 %v106_v19  ;;  %v94_v31 = vld [vmem:[%s578_s3 + $0x8] sm:$0xff]  ;;  %v93_v32 = vld [vmem:[%s578_s3] sm:$0xff]  ;;  %v148_v34 = vld [vmem:[%s580_s5 + $0x78] sm:$0xff] }
  0x13   :  { %v272_v33 = vld [vmem:[%s577_s2] ss:$0 sm:$0xff]  ;;  %v147_v35 = vld [vmem:[%s580_s5 + $0x70] sm:$0xff]  ;;  %153 = vmatpush.msra.mxu2 %v148_v34  ;;  %v146_v38 = vld [vmem:[%s580_s5 + $0x68] sm:$0xff] }
  0x14   :  { %63 = vmatpush.msra.mxu0 %v40_v9  ;;  %116 = vmatpush.msra.mxu1 %v105_v20  ;;  %v145_v40 = vld [vmem:[%s580_s5 + $0x60] sm:$0xff]  ;;  %v144_v41 = vld [vmem:[%s580_s5 + $0x58] sm:$0xff]  ;;  %v143_v42 = vld [vmem:[%s580_s5 + $0x50] sm:$0xff] }
  0x15   :  { %154 = vmatpush.msra.mxu2 %v147_v35  ;;  %v142_v43 = vld [vmem:[%s580_s5 + $0x48] sm:$0xff]  ;;  %v141_v45 = vld [vmem:[%s580_s5 + $0x40] sm:$0xff]  ;;  %v140_v47 = vld [vmem:[%s580_s5 + $0x38] sm:$0xff] }
  0x16   :  { %64 = vmatpush.msra.mxu0 %v39_v10  ;;  %117 = vmatpush.msra.mxu1 %v104_v21  ;;  %v139_v48 = vld [vmem:[%s580_s5 + $0x30] sm:$0xff]  ;;  %v138_v49 = vld [vmem:[%s580_s5 + $0x28] sm:$0xff]  ;;  %v137_v50 = vld [vmem:[%s580_s5 + $0x20] sm:$0xff] }
  0x17   :  { %155 = vmatpush.msra.mxu2 %v146_v38  ;;  %v136_v53 = vld [vmem:[%s580_s5 + $0x18] sm:$0xff]  ;;  %v135_v55 = vld [vmem:[%s580_s5 + $0x10] sm:$0xff]  ;;  %v134_v63 = vld [vmem:[%s580_s5 + $0x8] sm:$0xff] }
  0x18   :  { %65 = vmatpush.msra.mxu0 %v38_v11  ;;  %118 = vmatpush.msra.mxu1 %v103_v22  ;;  %v133_v0 = vld [vmem:[%s580_s5] sm:$0xff]  ;;  %v207_v4 = vld [vmem:[%s582_s7 + $0x78] sm:$0xff]  ;;  %v206_v5 = vld [vmem:[%s582_s7 + $0x70] sm:$0xff] }
  0x19   :  { %156 = vmatpush.msra.mxu2 %v145_v40  ;;  %v273_v1 = vld [vmem:[%s579_s4] ss:$0 sm:$0xff]  ;;  %212 = vmatpush.msra.mxu3 %v207_v4  ;;  %v205_v6 = vld [vmem:[%s582_s7 + $0x68] sm:$0xff]  ;;  %v203_v8 = vld [vmem:[%s582_s7 + $0x58] sm:$0xff]  ;;  %s314_s4 = smov [#allocation2]  }
  0x1a   :  { %66 = vmatpush.msra.mxu0 %v37_v12  ;;  %119 = vmatpush.msra.mxu1 %v102_v23  ;;  %v204_v7 = vld [vmem:[%s582_s7 + $0x60] sm:$0xff]  ;;  %v202_v9 = vld [vmem:[%s582_s7 + $0x50] sm:$0xff]  ;;  %v201_v10 = vld [vmem:[%s582_s7 + $0x48] sm:$0xff]  ;;  %s257_s23 = sshll.u32 %s314_s4, 4  ;;  %s258_s23 = int_to_ptr.vmem [resolvable:$true] %s257_s23 }
  0x1b   :  { %157 = vmatpush.msra.mxu2 %v144_v41  ;;  %213 = vmatpush.msra.mxu3 %v206_v5  ;;  %v200_v11 = vld [vmem:[%s582_s7 + $0x40] sm:$0xff]  ;;  %v199_v12 = vld [vmem:[%s582_s7 + $0x38] sm:$0xff]  ;;  %v194_v17 = vld [vmem:[%s582_s7 + $0x10] sm:$0xff] }
  0x1c   :  { %67 = vmatpush.msra.mxu0 %v36_v13  ;;  %120 = vmatpush.msra.mxu1 %v101_v24  ;;  %v198_v13 = vld [vmem:[%s582_s7 + $0x30] sm:$0xff]  ;;  %v193_v18 = vld [vmem:[%s582_s7 + $0x8] sm:$0xff]  ;;  %v192_v19 = vld [vmem:[%s582_s7] sm:$0xff] }
  0x1d   :  { %158 = vmatpush.msra.mxu2 %v143_v42  ;;  %214 = vmatpush.msra.mxu3 %v205_v6  ;;  %v274_v20 = vld [vmem:[%s581_s6] ss:$0 sm:$0xff] }
  0x1e   :  { %68 = vmatpush.msra.mxu0 %v35_v14  ;;  %121 = vmatpush.msra.mxu1 %v100_v25  ;;  %v197_v14 = vld [vmem:[%s582_s7 + $0x28] sm:$0xff] }
  0x1f   :  { %159 = vmatpush.msra.mxu2 %v142_v43  ;;  %215 = vmatpush.msra.mxu3 %v204_v7 }
  0x20   :  { %69 = vmatpush.msra.mxu0 %v34_v15  ;;  %122 = vmatpush.msra.mxu1 %v99_v26  ;;  %v196_v15 = vld [vmem:[%s582_s7 + $0x20] sm:$0xff] }
  0x21   :  { %70 = vmatmul.f32.vlgmr.msra.gmra.mxu0 %v33_v16  ;;  %160 = vmatpush.msra.mxu2 %v141_v45  ;;  %v195_v16 = vld [vmem:[%s582_s7 + $0x18] sm:$0xff] }
  0x22   :  { %123 = vmatpush.msra.mxu1 %v98_v27  ;;  %216 = vmatpush.msra.mxu3 %v203_v8 }
  0x23   :  { %161 = vmatpush.msra.mxu2 %v140_v47 }
  0x24   :  { %124 = vmatpush.msra.mxu1 %v97_v28  ;;  %217 = vmatpush.msra.mxu3 %v202_v9 }
  0x25   :  { %162 = vmatpush.msra.mxu2 %v139_v48 }
  0x26   :  { %125 = vmatpush.msra.mxu1 %v96_v29  ;;  %218 = vmatpush.msra.mxu3 %v201_v10 }
  0x27   :  { %163 = vmatpush.msra.mxu2 %v138_v49 }
  0x28   :  { %126 = vmatpush.msra.mxu1 %v95_v30  ;;  %219 = vmatpush.msra.mxu3 %v200_v11 }
  0x29   :  { %164 = vmatpush.msra.mxu2 %v137_v50 }
  0x2a   :  { %127 = vmatpush.msra.mxu1 %v94_v31  ;;  %220 = vmatpush.msra.mxu3 %v199_v12 }
  0x2b   :  { %165 = vmatpush.msra.mxu2 %v136_v53 }
  0x2c   :  { %128 = vmatpush.msra.mxu1 %v93_v32  ;;  %221 = vmatpush.msra.mxu3 %v198_v13 }
  0x2d   :  { %166 = vmatpush.msra.mxu2 %v135_v55 }
  0x2e   :  { %222 = vmatpush.msra.mxu3 %v197_v14 }
  0x2f   :  { %167 = vmatpush.msra.mxu2 %v134_v63 }
  0x30   :  { %223 = vmatpush.msra.mxu3 %v196_v15 }
  0x31   :  { %168 = vmatpush.msra.mxu2 %v133_v0 }
  0x32   :  { %224 = vmatpush.msra.mxu3 %v195_v16 }
  0x34   :  { %225 = vmatpush.msra.mxu3 %v194_v17 }
  0x36   :  { %226 = vmatpush.msra.mxu3 %v193_v18 }
  0x38   :  { %227 = vmatpush.msra.mxu3 %v192_v19 }
  0x9e   :  { %v71_v36 = vpop.f32.mrf.mxu0 }
  0x9f   :  { %v72_v37 = vadd.f32 %v272_v33, %v71_v36  ;;  %v275_v36 = vld [vmem:[%s583_s8] ss:$0 sm:$0xff]  ;;  %s259_s8 = sshll.u32 %s584_s9, 4  ;;  %s260_s8 = int_to_ptr.hbm [resolvable:$true] %s259_s8 }
  0xa1   :  { %v268_v39 = vmul.f32 -1.442695, %v72_v37 }
  0xa3   :  { %276 = vpow2.f32 %v268_v39 }
  0xa9   :  { %v277_v44 = vpop.eup %276 }
  0xaa   :  { %v77_v46 = vadd.f32 1.0, %v277_v44 }
  0xac   :  { %278 = vrcp.f32 %v77_v46  ;;  %v89_v56 = vand.u32 2147483648, %v77_v46  ;;  %v87_v58 = vand.u32 2147483647, %v77_v46  ;;  %vm83_vm1 = vweird.f32 %v77_v46 }
  0xae   :  { %v90_v60 = vor.u32 1.1754944e-38, %v89_v56  ;;  %vm88_vm3 = vcmp.eq.f32.partialorder %v87_v58, 8.507059e+37 }
  0xb2   :  { %v279_v51 = vpop.eup %278 }
  0xb3   :  { %v79_v52 = vmul.f32 %v279_v51, %v77_v46  ;;  %vm84_vm0 = vweird.f32 %v279_v51 }
  0xb4   :  { %vm85_vm2 = vmor %vm83_vm1, %vm84_vm0 }
  0xb5   :  { %v80_v54 = vsub.f32 1.0, %v79_v52 }
  0xb7   :  { %v81_v57 = vmul.f32 %v279_v51, %v80_v54 }
  0xb9   :  { %v82_v59 = vadd.f32 %v279_v51, %v81_v57 }
  0xbb   :  { %v86_v61 = vsel %vm85_vm2, %v279_v51, %v82_v59 }
  0xbc   :  { %v91_v62 = vsel %vm88_vm3, %v90_v60, %v86_v61 }
  0xbd   :  { %129 = vmatmul.f32.vlgmr.msra.gmra.mxu1 %v91_v62 }
 0x13a   :  { %v130_v2 = vpop.f32.mrf.mxu1 }
 0x13b   :  { %v131_v3 = vadd.f32 %v273_v1, %v130_v2 }
 0x13d   :  { %169 = vmatmul.f32.vlgmr.msra.gmra.mxu2 %v131_v3 }
 0x1c0   :  { %v170_v21 = vpop.f32.mrf.mxu2 }
 0x1c1   :  { %v171_v22 = vadd.f32 %v274_v20, %v170_v21 }
 0x1c3   :  { %v269_v23 = vmul.f32 -1.442695, %v171_v22 }
 0x1c5   :  { %280 = vpow2.f32 %v269_v23 }
 0x1cb   :  { %v281_v24 = vpop.eup %280 }
 0x1cc   :  { %v176_v25 = vadd.f32 1.0, %v281_v24 }
 0x1ce   :  { %282 = vrcp.f32 %v176_v25  ;;  %v188_v29 = vand.u32 2147483648, %v176_v25  ;;  %v186_v31 = vand.u32 2147483647, %v176_v25  ;;  %vm182_vm5 = vweird.f32 %v176_v25 }
 0x1d0   :  { %v189_v33 = vor.u32 1.1754944e-38, %v188_v29  ;;  %vm187_vm7 = vcmp.eq.f32.partialorder %v186_v31, 8.507059e+37 }
 0x1d4   :  { %v283_v26 = vpop.eup %282 }
 0x1d5   :  { %v178_v27 = vmul.f32 %v283_v26, %v176_v25  ;;  %vm183_vm4 = vweird.f32 %v283_v26 }
 0x1d6   :  { %vm184_vm6 = vmor %vm182_vm5, %vm183_vm4 }
 0x1d7   :  { %v179_v28 = vsub.f32 1.0, %v178_v27 }
 0x1d9   :  { %v180_v30 = vmul.f32 %v283_v26, %v179_v28 }
 0x1db   :  { %v181_v32 = vadd.f32 %v283_v26, %v180_v30 }
 0x1dd   :  { %v185_v34 = vsel %vm184_vm6, %v283_v26, %v181_v32 }
 0x1de   :  { %v190_v35 = vsel %vm187_vm7, %v189_v33, %v185_v34 }
 0x1df   :  { %228 = vmatmul.f32.vlgmr.msra.gmra.mxu3 %v190_v35 }
 0x262   :  { %v229_v37 = vpop.f32.mrf.mxu3 }
 0x263   :  { %v230_v38 = vadd.f32 %v275_v36, %v229_v37 }
 0x265   :  { %v270_v39 = vmul.f32 -1.442695, %v230_v38 }
 0x267   :  { %284 = vpow2.f32 %v270_v39 }
 0x26d   :  { %v285_v40 = vpop.eup %284 }
 0x26e   :  { %v235_v41 = vadd.f32 1.0, %v285_v40 }
 0x270   :  { %286 = vrcp.f32 %v235_v41  ;;  %v247_v45 = vand.u32 2147483648, %v235_v41  ;;  %v245_v47 = vand.u32 2147483647, %v235_v41  ;;  %vm241_vm9 = vweird.f32 %v235_v41 }
 0x272   :  { %v248_v49 = vor.u32 1.1754944e-38, %v247_v45  ;;  %vm246_vm11 = vcmp.eq.f32.partialorder %v245_v47, 8.507059e+37 }
 0x276   :  { %v287_v42 = vpop.eup %286 }
 0x277   :  { %v237_v43 = vmul.f32 %v287_v42, %v235_v41  ;;  %vm242_vm8 = vweird.f32 %v287_v42 }
 0x278   :  { %vm243_vm10 = vmor %vm241_vm9, %vm242_vm8 }
 0x279   :  { %v238_v44 = vsub.f32 1.0, %v237_v43 }
 0x27b   :  { %v239_v46 = vmul.f32 %v287_v42, %v238_v44 }
 0x27d   :  { %v240_v48 = vadd.f32 %v287_v42, %v239_v46 }
 0x27f   :  { %v244_v50 = vsel %vm243_vm10, %v287_v42, %v240_v48 }
 0x280   :  { %v249_v51 = vsel %vm246_vm11, %v248_v49, %v244_v50 }
 0x281   :  { %251 = vst [vmem:[#allocation2] sm:$0xff] %v249_v51 }
 0x282   :  { %262 = dma.vmem_to_hbm [thread:$0]  %s258_s23, 128, %s260_s8, [#allocation3]  }
 0x283   :  { %312 = dma.done.wait [#allocation3], 128  }
 0x284   :  { %313 = vsyncadd [#allocation3], 4294967168 }
 0x285   :  { %267 = vsyncpa [#allocation3], 1 }

</bundles_post_ra>
